<compile_context>
chip_gen: v5e
topology: v5e:2x2
jax: 0.10.0
libtpu: 0.0.40
codegen_flags: <defaults>
</compile_context>

<pallas_src>
import jax
import jax.numpy as jnp
from jax.experimental import pallas as pl
from jax.experimental.pallas import tpu as pltpu


def _round_up(x: int, m: int) -> int:
    return (x + m - 1) // m * m


def _cosine_sim_kernel(x1_ref, x2_ref, inv1_ref, inv2_ref, o_ref, acc_ref):
    k = pl.program_id(2)

    @pl.when(k == 0)
    def _():
        acc_ref[...] = jnp.zeros_like(acc_ref)

    # [tm, tk] x [tn, tk] block matmul on the MXU, contracting the K axis of
    # both operands -- no in-kernel transpose.
    acc_ref[...] += jax.lax.dot_general(
        x1_ref[...], x2_ref[...],
        dimension_numbers=(((1,), (1,)), ((), ())),
        preferred_element_type=jnp.float32,
    )

    @pl.when(k == pl.num_programs(2) - 1)
    def _():
        # Epilogue: scale by the outer product of inverse norms, then map
        # [-1, 1] -> [0, 1].  All math stays in f32 on the accumulator; only
        # the final store casts to the output dtype.
        sim = acc_ref[...] * inv1_ref[...] * inv2_ref[...]
        o_ref[...] = ((sim + 1.0) * 0.5).astype(o_ref.dtype)


def cosine_similarity_matrix(x1, x2, eps: float = 1e-8,
                             tm: int = 256, tn: int = 256, tk: int = 512):
    """Pallas TPU implementation of cosine_similarity_matrix (dim=1)."""
    assert x1.ndim == 2 and x2.ndim == 2 and x1.shape[1] == x2.shape[1]
    n1, d = x1.shape
    n2, _ = x2.shape

    # 128-aligned tiles, never larger than the (padded) problem.  Defaults
    # keep double-buffered VMEM use around ~3 MiB, far below the scoped
    # default on v5e/v6e and safe on v7x's smaller 64 MiB VMEM.
    tm = min(tm, _round_up(n1, 128))
    tn = min(tn, _round_up(n2, 128))
    tk = min(tk, _round_up(d, 128))
    n1p, n2p, dp = _round_up(n1, tm), _round_up(n2, tn), _round_up(d, tk)

    # Per-row inverse norms, computed once (XLA fuses this).  Clamping the
    # squared norm at eps^2 matches torch's clamp(norm, min=eps) semantics.
    sq1 = jnp.sum(jnp.square(x1.astype(jnp.float32)), axis=1, keepdims=True)
    sq2 = jnp.sum(jnp.square(x2.astype(jnp.float32)), axis=1, keepdims=True)
    inv1 = jax.lax.rsqrt(jnp.maximum(sq1, eps * eps))        # [n1, 1]
    inv2 = jax.lax.rsqrt(jnp.maximum(sq2, eps * eps)).T      # [1, n2]

    # Zero-pad to tile-aligned, lane-dense shapes (dot/norm-safe padding).
    x1p = jnp.zeros((n1p, dp), x1.dtype).at[:n1, :d].set(x1)
    x2p = jnp.zeros((n2p, dp), x2.dtype).at[:n2, :d].set(x2)
    inv1p = jnp.zeros((n1p, 1), jnp.float32).at[:n1, :].set(inv1)
    inv2p = jnp.zeros((1, n2p), jnp.float32).at[:, :n2].set(inv2)

    grid = (n1p // tm, n2p // tn, dp // tk)

    cost = pl.CostEstimate(
        flops=2 * n1p * n2p * dp,
        transcendentals=0,
        bytes_accessed=(x1p.size * x1p.dtype.itemsize
                        + x2p.size * x2p.dtype.itemsize
                        + (inv1p.size + inv2p.size) * 4
                        + n1p * n2p * 4),
    )

    out = pl.pallas_call(
        _cosine_sim_kernel,
        out_shape=jax.ShapeDtypeStruct((n1p, n2p), jnp.float32),
        grid_spec=pltpu.PrefetchScalarGridSpec(
            num_scalar_prefetch=0,
            grid=grid,
            in_specs=[
                pl.BlockSpec((tm, tk), lambda i, j, k: (i, k)),   # x1 tile
                pl.BlockSpec((tn, tk), lambda i, j, k: (j, k)),   # x2 tile
                pl.BlockSpec((tm, 1), lambda i, j, k: (i, 0)),    # inv-norms x1
                pl.BlockSpec((1, tn), lambda i, j, k: (0, j)),    # inv-norms x2
            ],
            out_specs=pl.BlockSpec((tm, tn), lambda i, j, k: (i, j)),
            scratch_shapes=[pltpu.VMEM((tm, tn), jnp.float32)],
        ),
        compiler_params=pltpu.CompilerParams(
            dimension_semantics=("parallel", "parallel", "arbitrary"),
        ),
        cost_estimate=cost,
    )(x1p, x2p, inv1p, inv2p)

    return out[:n1, :n2]


def _reference(x1, x2, eps=1e-8):
    n1 = jnp.linalg.norm(x1, axis=1, keepdims=True)
    n2 = jnp.linalg.norm(x2, axis=1, keepdims=True)
    x1n = x1 / jnp.maximum(n1, eps)
    x2n = x2 / jnp.maximum(n2, eps)
    return (x1n @ x2n.T + 1.0) / 2.0


# TODO(synk): the rest of JointModel.forward (CNN/RN18 feature extractors,
# TransformerEncoder stacks, SoftHd Hungarian distance, TripletLoss) depends
# on torch submodules not defined in the spec; only the shared
# cosine_similarity_matrix op is kernelized here.

if __name__ == "__main__":
    key = jax.random.PRNGKey(0)
    k1, k2, k3, k4 = jax.random.split(key, 4)

    # Small shapes consistent with JointModel.retrieve: N1=8 aggregated doc
    # embeddings vs N2=16 aggregated query embeddings, embedding_dim D=32.
    x1 = jax.random.normal(k1, (8, 32), dtype=jnp.float32)
    x2 = jax.random.normal(k2, (16, 32), dtype=jnp.float32)
    sim = jax.block_until_ready(cosine_similarity_matrix(x1, x2))
    ref = _reference(x1, x2)
    assert sim.shape == (8, 16)
    assert jnp.allclose(sim, ref, atol=1e-5, rtol=1e-5)

    # Non-aligned shapes that exercise padding and the multi-step tiled grid
    # (2 x 2 x 2 with the f32 accumulator init / epilogue paths).
    y1 = jax.random.normal(k3, (300, 700), dtype=jnp.float32)
    y2 = jax.random.normal(k4, (270, 700), dtype=jnp.float32)
    sim2 = jax.block_until_ready(cosine_similarity_matrix(y1, y2))
    ref2 = _reference(y1, y2)
    assert sim2.shape == (300, 270)
    assert jnp.allclose(sim2, ref2, atol=1e-4, rtol=1e-4)

    print("KERNEL_OK")
</pallas_src>

<mosaic_0001>
module attributes {stable_mosaic.version = 11 : i64} {
  func.func @_cosine_sim_kernel(%arg0: i32, %arg1: i32, %arg2: i32, %arg3: memref<128x128xf32, #tpu.memory_space<vmem>>, %arg4: memref<128x128xf32, #tpu.memory_space<vmem>>, %arg5: memref<128x1xf32, #tpu.memory_space<vmem>>, %arg6: memref<1x128xf32, #tpu.memory_space<vmem>>, %arg7: memref<128x128xf32, #tpu.memory_space<vmem>>, %arg8: memref<128x128xf32, #tpu.memory_space<vmem>>) attributes {dimension_semantics = [#tpu.dimension_semantics<parallel>, #tpu.dimension_semantics<parallel>, #tpu.dimension_semantics<arbitrary>], iteration_bounds = array<i64: 1, 1, 1>, scalar_prefetch = 0 : i64, scratch_operands = 1 : i64, tpu.core_type = #tpu.core_type<tc>, window_params = [{transform_indices = @transform_0, window_bounds = array<i64: 128, 128>}, {transform_indices = @transform_1, window_bounds = array<i64: 128, 128>}, {transform_indices = @transform_2, window_bounds = array<i64: 128, 1>}, {transform_indices = @transform_3, window_bounds = array<i64: 1, 128>}, {transform_indices = @transform_4, window_bounds = array<i64: 128, 128>}]} {
    %c0_i32 = arith.constant 0 : i32
    %0 = arith.cmpi eq, %arg2, %c0_i32 : i32
    %1 = arith.extui %0 : i1 to i32
    %c0_i32_0 = arith.constant 0 : i32
    %2 = arith.cmpi ne, %1, %c0_i32_0 : i32
    scf.if %2 {
      %cst_10 = arith.constant 0.000000e+00 : f32
      %12 = vector.broadcast %cst_10 : f32 to vector<128x128xf32>
      %c0_11 = arith.constant 0 : index
      %c0_12 = arith.constant 0 : index
      %13 = vector.load %arg8[%c0_11, %c0_12] : memref<128x128xf32, #tpu.memory_space<vmem>>, vector<128x128xf32>
      tpu.vector_store %arg8[%c0_11, %c0_12], %12 {strides = array<i32>} : memref<128x128xf32, #tpu.memory_space<vmem>>, vector<128x128xf32>,
    } else {
    }
    %c0 = arith.constant 0 : index
    %c0_1 = arith.constant 0 : index
    %3 = vector.load %arg8[%c0, %c0_1] : memref<128x128xf32, #tpu.memory_space<vmem>>, vector<128x128xf32>
    %c0_2 = arith.constant 0 : index
    %c0_3 = arith.constant 0 : index
    %4 = vector.load %arg3[%c0_2, %c0_3] : memref<128x128xf32, #tpu.memory_space<vmem>>, vector<128x128xf32>
    %c0_4 = arith.constant 0 : index
    %c0_5 = arith.constant 0 : index
    %5 = vector.load %arg4[%c0_4, %c0_5] : memref<128x128xf32, #tpu.memory_space<vmem>>, vector<128x128xf32>
    %cst = arith.constant dense<0.000000e+00> : vector<128x128xf32>
    %6 = tpu.matmul %4, %5, %cst {dimension_numbers = #tpu.dot_dimension_numbers<[1], [1], [0], [0], [0, 0, 1, 0], [], []>} : vector<128x128xf32>, vector<128x128xf32>, vector<128x128xf32> -> vector<128x128xf32>
    %7 = arith.addf %3, %6 : vector<128x128xf32>
    %c0_6 = arith.constant 0 : index
    %c0_7 = arith.constant 0 : index
    %8 = vector.load %arg8[%c0_6, %c0_7] : memref<128x128xf32, #tpu.memory_space<vmem>>, vector<128x128xf32>
    tpu.vector_store %arg8[%c0_6, %c0_7], %7 {strides = array<i32>} : memref<128x128xf32, #tpu.memory_space<vmem>>, vector<128x128xf32>,
    %c0_i32_8 = arith.constant 0 : i32
    %9 = arith.cmpi eq, %arg2, %c0_i32_8 : i32
    %10 = arith.extui %9 : i1 to i32
    %c0_i32_9 = arith.constant 0 : i32
    %11 = arith.cmpi ne, %10, %c0_i32_9 : i32
    scf.if %11 {
      %c0_10 = arith.constant 0 : index
      %c0_11 = arith.constant 0 : index
      %12 = vector.load %arg8[%c0_10, %c0_11] : memref<128x128xf32, #tpu.memory_space<vmem>>, vector<128x128xf32>
      %c0_12 = arith.constant 0 : index
      %c0_13 = arith.constant 0 : index
      %13 = vector.load %arg5[%c0_12, %c0_13] : memref<128x1xf32, #tpu.memory_space<vmem>>, vector<128x1xf32>
      %14 = vector.broadcast %13 : vector<128x1xf32> to vector<128x128xf32>
      %15 = arith.mulf %12, %14 : vector<128x128xf32>
      %c0_14 = arith.constant 0 : index
      %c0_15 = arith.constant 0 : index
      %16 = vector.load %arg6[%c0_14, %c0_15] : memref<1x128xf32, #tpu.memory_space<vmem>>, vector<1x128xf32>
      %17 = vector.broadcast %16 : vector<1x128xf32> to vector<128x128xf32>
      %18 = arith.mulf %15, %17 : vector<128x128xf32>
      %cst_16 = arith.constant 1.000000e+00 : f32
      %19 = vector.broadcast %cst_16 : f32 to vector<128x128xf32>
      %20 = arith.addf %18, %19 : vector<128x128xf32>
      %cst_17 = arith.constant 5.000000e-01 : f32
      %21 = vector.broadcast %cst_17 : f32 to vector<128x128xf32>
      %22 = arith.mulf %20, %21 : vector<128x128xf32>
      %c0_18 = arith.constant 0 : index
      %c0_19 = arith.constant 0 : index
      %23 = vector.load %arg7[%c0_18, %c0_19] : memref<128x128xf32, #tpu.memory_space<vmem>>, vector<128x128xf32>
      tpu.vector_store %arg7[%c0_18, %c0_19], %22 {strides = array<i32>} : memref<128x128xf32, #tpu.memory_space<vmem>>, vector<128x128xf32>,
    } else {
    }
    return
  }
  func.func @transform_0(%arg0: i32, %arg1: i32, %arg2: i32) -> (i32, i32) {
    %c0_i32 = arith.constant 0 : i32
    return %arg0, %arg2 : i32, i32
  }
  func.func @transform_1(%arg0: i32, %arg1: i32, %arg2: i32) -> (i32, i32) {
    %c0_i32 = arith.constant 0 : i32
    return %arg1, %arg2 : i32, i32
  }
  func.func @transform_2(%arg0: i32, %arg1: i32, %arg2: i32) -> (i32, i32) {
    %c0_i32 = arith.constant 0 : i32
    %c0_i32_0 = arith.constant 0 : i32
    return %arg0, %c0_i32 : i32, i32
  }
  func.func @transform_3(%arg0: i32, %arg1: i32, %arg2: i32) -> (i32, i32) {
    %c0_i32 = arith.constant 0 : i32
    %c0_i32_0 = arith.constant 0 : i32
    return %c0_i32, %arg1 : i32, i32
  }
  func.func @transform_4(%arg0: i32, %arg1: i32, %arg2: i32) -> (i32, i32) {
    %c0_i32 = arith.constant 0 : i32
    return %arg0, %arg1 : i32, i32
  }
}

</mosaic_0001>

<bundles_post_ra>
// kernel: tpu_custom_call.1
= control target key start
LH: loop header
LB: loop body
LE: loop exit
PB: predicated region body
PF: predicated region fallthrough
CT: control target
= control target key end

     0   :  { %9 = vsyncpa [#allocation4], 0  ;;  %s694_s0 = inlined_call_operand.vmem [shape: f32[128,128], index: 0, kind: input, shape index: {}]   ;;  %s695_s1 = inlined_call_operand.hbm [shape: f32[128,128], index: 1, kind: input, shape index: {}]   ;;  %s696_s2 = inlined_call_operand.vmem [shape: f32[128,1], index: 2, kind: input, shape index: {}]   ;;  %s697_s3 = inlined_call_operand.vmem [shape: f32[1,128], index: 3, kind: input, shape index: {}]   ;;  %s698_s4 = inlined_call_operand.hbm [shape: f32[128,128], index: 4, kind: output, shape index: {}]  }
   0x1   :  { %10 = vsyncpa [#allocation5], 0  ;;  %s17_s17 = sshll.u32 %s695_s1, 4  ;;  %s526_s18 = smov [#allocation3]   ;;  %s18_s17 = int_to_ptr.hbm [resolvable:$true] %s17_s17 }
   0x2   :  { %s19_s19 = sshll.u32 %s526_s18, 4  ;;  %s527_s20 = smov 128   ;;  %s20_s19 = int_to_ptr.vmem [resolvable:$true] %s19_s19 }
   0x3   :  { %s528_s21 = smov 8  }
   0x4   :  { %25 = dma.hbm_to_vmem [thread:$0]  %s18_s17, 2048, %s20_s19, [#allocation4], %s527_s20, %s527_s20, %s528_s21  }
   0x5   :  { %522 = dma.done.wait [#allocation4], 2048  }
   0x6   :  { %523 = vsyncadd [#allocation4], 4294965248  ;;  %v529_v0 = vmov 0   ;;  %v101_v1 = vld [vmem:[#allocation3 + $0x78] sm:$0xff]  ;;  %v100_v2 = vld [vmem:[#allocation3 + $0x70] sm:$0xff]  ;;  %s404_s12 = sshll.u32 %s698_s4, 4  ;;  %s405_s12 = int_to_ptr.hbm [resolvable:$true] %s404_s12 }
   0x7   :  { %470 = vset.pattern.permute.xlu0 %v529_v0  ;;  %471 = vset.pattern.permute.xlu1 %v529_v0  ;;  %v218_v3 = vld [vmem:[%s696_s2] sm:$0xff]  ;;  %v99_v4 = vld [vmem:[#allocation3 + $0x68] sm:$0xff]  ;;  %v220_v5 = vld [vmem:[%s696_s2 + $0x10] sm:$0xff] }
   0x8   :  { %472 = vset.pattern.permute.xlu2 %v529_v0  ;;  %102 = vmatpush.xpose.msra.mxu0 %v101_v1  ;;  %v219_v6 = vld [vmem:[%s696_s2 + $0x8] sm:$0xff]  ;;  %v98_v7 = vld [vmem:[#allocation3 + $0x60] sm:$0xff]  ;;  %v97_v8 = vld [vmem:[#allocation3 + $0x58] sm:$0xff] }
   0x9   :  { %417 = vmatpush.xpose.msra.mxu1 %v101_v1  ;;  %418 = vmatpush.xpose.msra.mxu2 %v101_v1  ;;  %v221_v9 = vld [vmem:[%s696_s2 + $0x18] sm:$0xff]  ;;  %v224_v10 = vld [vmem:[%s696_s2 + $0x30] sm:$0xff]  ;;  %v95_v12 = vld [vmem:[#allocation3 + $0x48] sm:$0xff] }
   0xa   :  { %419 = vmatpush.xpose.msra.mxu3 %v101_v1  ;;  %236 = vperm.xlu0 %470, %v218_v3   ;;  %v96_v11 = vld [vmem:[#allocation3 + $0x50] sm:$0xff]  ;;  %v225_v13 = vld [vmem:[%s696_s2 + $0x38] sm:$0xff]  ;;  %v227_v14 = vld [vmem:[%s696_s2 + $0x48] sm:$0xff] }
   0xb   :  { %246 = vperm.xlu1 %471, %v220_v5   ;;  %v94_v15 = vld [vmem:[#allocation3 + $0x40] sm:$0xff]  ;;  %v93_v16 = vld [vmem:[#allocation3 + $0x38] sm:$0xff]  ;;  %v228_v19 = vld [vmem:[%s696_s2 + $0x50] sm:$0xff] }
   0xc   :  { %103 = vmatpush.xpose.msra.mxu0 %v100_v2  ;;  %v230_v17 = vld [vmem:[%s696_s2 + $0x60] sm:$0xff]  ;;  %v92_v20 = vld [vmem:[#allocation3 + $0x30] sm:$0xff]  ;;  %v91_v21 = vld [vmem:[#allocation3 + $0x28] sm:$0xff] }
   0xd   :  { %420 = vmatpush.xpose.msra.mxu1 %v100_v2  ;;  %421 = vmatpush.xpose.msra.mxu2 %v100_v2  ;;  %v222_v18 = vld [vmem:[%s696_s2 + $0x20] sm:$0xff]  ;;  %v233_v22 = vld [vmem:[%s696_s2 + $0x78] sm:$0xff]  ;;  %v223_v23 = vld [vmem:[%s696_s2 + $0x28] sm:$0xff] }
   0xe   :  { %422 = vmatpush.xpose.msra.mxu3 %v100_v2  ;;  %256 = vperm.xlu2 %472, %v222_v18   ;;  %v231_v24 = vld [vmem:[%s696_s2 + $0x68] sm:$0xff]  ;;  %v90_v25 = vld [vmem:[#allocation3 + $0x20] sm:$0xff]  ;;  %v89_v26 = vld [vmem:[#allocation3 + $0x18] sm:$0xff] }
   0xf   :  { %v226_v27 = vld [vmem:[%s696_s2 + $0x40] sm:$0xff]  ;;  %v88_v28 = vld [vmem:[#allocation3 + $0x10] sm:$0xff]  ;;  %v87_v29 = vld [vmem:[#allocation3 + $0x8] sm:$0xff] }
  0x10   :  { %104 = vmatpush.xpose.msra.mxu0 %v99_v4  ;;  %v229_v30 = vld [vmem:[%s696_s2 + $0x58] sm:$0xff]  ;;  %v86_v31 = vld [vmem:[#allocation3] sm:$0xff]  ;;  %v232_v36 = vld [vmem:[%s696_s2 + $0x70] sm:$0xff] }
  0x11   :  { %423 = vmatpush.xpose.msra.mxu1 %v99_v4  ;;  %424 = vmatpush.xpose.msra.mxu2 %v99_v4  ;;  %v70_v32 = vld [vmem:[%s694_s0] sm:$0xff]  ;;  %v71_v37 = vld [vmem:[%s694_s0 + $0x8] sm:$0xff]  ;;  %v72_v41 = vld [vmem:[%s694_s0 + $0x10] sm:$0xff] }
  0x12   :  { %425 = vmatpush.xpose.msra.mxu3 %v99_v4  ;;  %241 = vperm.xlu0 %470, %v219_v6   ;;  %v74_v33 = vld [vmem:[%s694_s0 + $0x20] sm:$0xff]  ;;  %v75_v38 = vld [vmem:[%s694_s0 + $0x28] sm:$0xff]  ;;  %v76_v42 = vld [vmem:[%s694_s0 + $0x30] sm:$0xff] }
  0x13   :  { %251 = vperm.xlu1 %471, %v221_v9   ;;  %v78_v34 = vld [vmem:[%s694_s0 + $0x40] sm:$0xff]  ;;  %v79_v39 = vld [vmem:[%s694_s0 + $0x48] sm:$0xff]  ;;  %v80_v43 = vld [vmem:[%s694_s0 + $0x50] sm:$0xff] }
  0x14   :  { %105 = vmatpush.xpose.msra.mxu0 %v98_v7  ;;  %v82_v35 = vld [vmem:[%s694_s0 + $0x60] sm:$0xff]  ;;  %v83_v40 = vld [vmem:[%s694_s0 + $0x68] sm:$0xff]  ;;  %v84_v44 = vld [vmem:[%s694_s0 + $0x70] sm:$0xff] }
  0x15   :  { %426 = vmatpush.xpose.msra.mxu1 %v98_v7  ;;  %427 = vmatpush.xpose.msra.mxu2 %v98_v7  ;;  %v73_v45 = vld [vmem:[%s694_s0 + $0x18] sm:$0xff]  ;;  %v665_v58 = vld [vmem:[%s697_s3] ss:$0 sm:$0xff] }
  0x16   :  { %428 = vmatpush.xpose.msra.mxu3 %v98_v7  ;;  %261 = vperm.xlu2 %472, %v223_v23   ;;  %v77_v46 = vld [vmem:[%s694_s0 + $0x38] sm:$0xff] }
  0x17   :  { %v81_v47 = vld [vmem:[%s694_s0 + $0x58] sm:$0xff] }
  0x18   :  { %106 = vmatpush.xpose.msra.mxu0 %v97_v8  ;;  %v85_v48 = vld [vmem:[%s694_s0 + $0x78] sm:$0xff]  ;;  %s530_s0 = smov [#allocation6]  }
  0x19   :  { %429 = vmatpush.xpose.msra.mxu1 %v97_v8  ;;  %430 = vmatpush.xpose.msra.mxu2 %v97_v8  ;;  %s402_s3 = sshll.u32 %s530_s0, 4  ;;  %s403_s3 = int_to_ptr.vmem [resolvable:$true] %s402_s3 }
  0x1a   :  { %431 = vmatpush.xpose.msra.mxu3 %v97_v8  ;;  %266 = vperm.xlu0 %470, %v224_v10  }
  0x1b   :  { %271 = vperm.xlu1 %471, %v225_v13  }
  0x1c   :  { %107 = vmatpush.xpose.msra.mxu0 %v96_v11 }
  0x1d   :  { %432 = vmatpush.xpose.msra.mxu1 %v96_v11  ;;  %433 = vmatpush.xpose.msra.mxu2 %v96_v11 }
  0x1e   :  { %434 = vmatpush.xpose.msra.mxu3 %v96_v11  ;;  %276 = vperm.xlu2 %472, %v226_v27  }
  0x20   :  { %108 = vmatpush.xpose.msra.mxu0 %v95_v12 }
  0x21   :  { %435 = vmatpush.xpose.msra.mxu1 %v95_v12  ;;  %436 = vmatpush.xpose.msra.mxu2 %v95_v12 }
  0x22   :  { %437 = vmatpush.xpose.msra.mxu3 %v95_v12  ;;  %281 = vperm.xlu0 %470, %v227_v14  }
  0x23   :  { %286 = vperm.xlu1 %471, %v228_v19  }
  0x24   :  { %109 = vmatpush.xpose.msra.mxu0 %v94_v15 }
  0x25   :  { %438 = vmatpush.xpose.msra.mxu1 %v94_v15  ;;  %439 = vmatpush.xpose.msra.mxu2 %v94_v15 }
  0x26   :  { %440 = vmatpush.xpose.msra.mxu3 %v94_v15  ;;  %291 = vperm.xlu2 %472, %v229_v30  }
  0x28   :  { %110 = vmatpush.xpose.msra.mxu0 %v93_v16 }
  0x29   :  { %441 = vmatpush.xpose.msra.mxu1 %v93_v16  ;;  %442 = vmatpush.xpose.msra.mxu2 %v93_v16 }
  0x2a   :  { %443 = vmatpush.xpose.msra.mxu3 %v93_v16  ;;  %296 = vperm.xlu0 %470, %v230_v17  }
  0x2b   :  { %301 = vperm.xlu1 %471, %v231_v24  }
  0x2c   :  { %111 = vmatpush.xpose.msra.mxu0 %v92_v20 }
  0x2d   :  { %444 = vmatpush.xpose.msra.mxu1 %v92_v20  ;;  %445 = vmatpush.xpose.msra.mxu2 %v92_v20 }
  0x2e   :  { %446 = vmatpush.xpose.msra.mxu3 %v92_v20  ;;  %306 = vperm.xlu2 %472, %v232_v36  }
  0x30   :  { %112 = vmatpush.xpose.msra.mxu0 %v91_v21 }
  0x31   :  { %447 = vmatpush.xpose.msra.mxu1 %v91_v21  ;;  %448 = vmatpush.xpose.msra.mxu2 %v91_v21 }
  0x32   :  { %449 = vmatpush.xpose.msra.mxu3 %v91_v21  ;;  %311 = vperm.xlu0 %470, %v233_v22  }
  0x34   :  { %113 = vmatpush.xpose.msra.mxu0 %v90_v25 }
  0x35   :  { %450 = vmatpush.xpose.msra.mxu1 %v90_v25  ;;  %451 = vmatpush.xpose.msra.mxu2 %v90_v25 }
  0x36   :  { %452 = vmatpush.xpose.msra.mxu3 %v90_v25 }
  0x38   :  { %114 = vmatpush.xpose.msra.mxu0 %v89_v26 }
  0x39   :  { %453 = vmatpush.xpose.msra.mxu1 %v89_v26  ;;  %454 = vmatpush.xpose.msra.mxu2 %v89_v26 }
  0x3a   :  { %455 = vmatpush.xpose.msra.mxu3 %v89_v26 }
  0x3c   :  { %115 = vmatpush.xpose.msra.mxu0 %v88_v28 }
  0x3d   :  { %456 = vmatpush.xpose.msra.mxu1 %v88_v28  ;;  %457 = vmatpush.xpose.msra.mxu2 %v88_v28 }
  0x3e   :  { %458 = vmatpush.xpose.msra.mxu3 %v88_v28 }
  0x40   :  { %116 = vmatpush.xpose.msra.mxu0 %v87_v29 }
  0x41   :  { %459 = vmatpush.xpose.msra.mxu1 %v87_v29  ;;  %460 = vmatpush.xpose.msra.mxu2 %v87_v29 }
  0x42   :  { %461 = vmatpush.xpose.msra.mxu3 %v87_v29 }
  0x44   :  { %117 = vmatpush.xpose.msra.mxu0 %v86_v31 }
  0x45   :  { %462 = vmatpush.xpose.msra.mxu1 %v86_v31  ;;  %463 = vmatpush.xpose.msra.mxu2 %v86_v31 }
  0x46   :  { %464 = vmatpush.xpose.msra.mxu3 %v86_v31 }
  0x47   :  { %118 = vmatmul.f32.vlgmr.msra.gmra.mxu0 %v70_v32 }
  0x48   :  { %130 = vmatmul.f32.vlgmr.msra.gmra.mxu1 %v74_v33  ;;  %142 = vmatmul.f32.vlgmr.msra.gmra.mxu2 %v78_v34 }
  0x49   :  { %154 = vmatmul.f32.vlgmr.msra.gmra.mxu3 %v82_v35 }
  0x4f   :  { %121 = vmatmul.f32.gmra.mxu0 %v71_v37 }
  0x50   :  { %133 = vmatmul.f32.gmra.mxu1 %v75_v38  ;;  %145 = vmatmul.f32.gmra.mxu2 %v79_v39 }
  0x51   :  { %157 = vmatmul.f32.gmra.mxu3 %v83_v40 }
  0x57   :  { %124 = vmatmul.f32.gmra.mxu0 %v72_v41 }
  0x58   :  { %136 = vmatmul.f32.gmra.mxu1 %v76_v42  ;;  %148 = vmatmul.f32.gmra.mxu2 %v80_v43 }
  0x59   :  { %160 = vmatmul.f32.gmra.mxu3 %v84_v44 }
  0x5f   :  { %127 = vmatmul.f32.gmra.mxu0 %v73_v45 }
  0x60   :  { %139 = vmatmul.f32.gmra.mxu1 %v77_v46  ;;  %151 = vmatmul.f32.gmra.mxu2 %v81_v47 }
  0x61   :  { %163 = vmatmul.f32.gmra.mxu3 %v85_v48 }
  0x68   :  { %v257_v52 = vpop.permute.xlu2 %256 }
  0x70   :  { %v262_v55 = vpop.permute.xlu2 %261 }
  0x78   :  { %v277_v63 = vpop.permute.xlu2 %276 }
  0x7c   :  { %v237_v49 = vpop.permute.xlu0 %236 }
  0x7d   :  { %v247_v50 = vpop.permute.xlu1 %246 }
  0x80   :  { %v673_v20 = vpop.permute.xlu2 %291 }
  0x84   :  { %v242_v51 = vpop.permute.xlu0 %241 }
  0x85   :  { %v658_v53 = vpop.permute.xlu1 %251 }
  0x88   :  { %v307_v46 = vpop.permute.xlu2 %306 }
  0x8c   :  { %v267_v54 = vpop.permute.xlu0 %266 }
  0x8d   :  { %v660_v56 = vpop.permute.xlu1 %271 }
  0x94   :  { %v282_v57 = vpop.permute.xlu0 %281 }
  0x95   :  { %v287_v2 = vpop.permute.xlu1 %286 }
  0x9c   :  { %v297_v5 = vpop.permute.xlu0 %296 }
  0x9d   :  { %v302_v25 = vpop.permute.xlu1 %301 }
  0xc4   :  { %v119_v59 = vpop.f32.mrf.mxu0 }
  0xc5   :  { %v131_v60 = vpop.f32.mrf.mxu1  ;;  %v314_v61 = vmul.f32 %v237_v49, %v119_v59 }
  0xc6   :  { %v318_v62 = vmul.f32 %v257_v52, %v131_v60 }
  0xc7   :  { %v334_v0 = vmul.f32 %v665_v58, %v314_v61 }
  0xc8   :  { %v338_v1 = vmul.f32 %v665_v58, %v318_v62 }
  0xc9   :  { %v350_v3 = vadd.f32 1.0, %v334_v0 }
  0xca   :  { %v354_v4 = vadd.f32 1.0, %v338_v1 }
  0xcb   :  { %v366_v6 = vmul.f32 0.5, %v350_v3  ;;  %v143_v8 = vpop.f32.mrf.mxu2 }
  0xcc   :  { %v370_v7 = vmul.f32 0.5, %v354_v4  ;;  %v155_v9 = vpop.f32.mrf.mxu3  ;;  %v322_v10 = vmul.f32 %v277_v63, %v143_v8  ;;  %v122_v12 = vpop.f32.mrf.mxu0 }
  0xcd   :  { %v326_v11 = vmul.f32 %v297_v5, %v155_v9  ;;  %v134_v13 = vpop.f32.mrf.mxu1  ;;  %382 = vst [vmem:[#allocation6] sm:$0xff] %v366_v6  ;;  %v315_v14 = vmul.f32 %v242_v51, %v122_v12  ;;  %v312_v6 = vpop.permute.xlu0 %311 }
  0xce   :  { %v319_v15 = vmul.f32 %v262_v55, %v134_v13  ;;  %386 = vst [vmem:[#allocation6 + $0x20] sm:$0xff] %v370_v7  ;;  %v342_v16 = vmul.f32 %v665_v58, %v322_v10 }
  0xcf   :  { %v346_v17 = vmul.f32 %v665_v58, %v326_v11  ;;  %v335_v18 = vmul.f32 %v665_v58, %v315_v14 }
  0xd0   :  { %v339_v19 = vmul.f32 %v665_v58, %v319_v15  ;;  %v358_v21 = vadd.f32 1.0, %v342_v16 }
  0xd1   :  { %v362_v22 = vadd.f32 1.0, %v346_v17  ;;  %v351_v23 = vadd.f32 1.0, %v335_v18 }
  0xd2   :  { %v355_v24 = vadd.f32 1.0, %v339_v19  ;;  %v374_v26 = vmul.f32 0.5, %v358_v21 }
  0xd3   :  { %v378_v27 = vmul.f32 0.5, %v362_v22  ;;  %v367_v28 = vmul.f32 0.5, %v351_v23  ;;  %v146_v30 = vpop.f32.mrf.mxu2 }
  0xd4   :  { %v371_v29 = vmul.f32 0.5, %v355_v24  ;;  %v158_v31 = vpop.f32.mrf.mxu3  ;;  %390 = vst [vmem:[#allocation6 + $0x40] sm:$0xff] %v374_v26  ;;  %v323_v32 = vmul.f32 %v282_v57, %v146_v30  ;;  %v125_v34 = vpop.f32.mrf.mxu0 }
  0xd5   :  { %v327_v33 = vmul.f32 %v302_v25, %v158_v31  ;;  %v137_v35 = vpop.f32.mrf.mxu1  ;;  %394 = vst [vmem:[#allocation6 + $0x60] sm:$0xff] %v378_v27  ;;  %v316_v36 = vmul.f32 %v247_v50, %v125_v34 }
  0xd6   :  { %v320_v37 = vmul.f32 %v267_v54, %v137_v35  ;;  %383 = vst [vmem:[#allocation6 + $0x8] sm:$0xff] %v367_v28  ;;  %v343_v38 = vmul.f32 %v665_v58, %v323_v32 }
  0xd7   :  { %v347_v39 = vmul.f32 %v665_v58, %v327_v33  ;;  %387 = vst [vmem:[#allocation6 + $0x28] sm:$0xff] %v371_v29  ;;  %v336_v40 = vmul.f32 %v665_v58, %v316_v36 }
  0xd8   :  { %v340_v41 = vmul.f32 %v665_v58, %v320_v37  ;;  %v359_v42 = vadd.f32 1.0, %v343_v38 }
  0xd9   :  { %v363_v43 = vadd.f32 1.0, %v347_v39  ;;  %v352_v44 = vadd.f32 1.0, %v336_v40 }
  0xda   :  { %v356_v45 = vadd.f32 1.0, %v340_v41  ;;  %v375_v47 = vmul.f32 0.5, %v359_v42 }
  0xdb   :  { %v379_v48 = vmul.f32 0.5, %v363_v43  ;;  %v368_v49 = vmul.f32 0.5, %v352_v44  ;;  %v149_v51 = vpop.f32.mrf.mxu2 }
  0xdc   :  { %v372_v50 = vmul.f32 0.5, %v356_v45  ;;  %v161_v52 = vpop.f32.mrf.mxu3  ;;  %391 = vst [vmem:[#allocation6 + $0x48] sm:$0xff] %v375_v47  ;;  %v324_v54 = vmul.f32 %v287_v2, %v149_v51  ;;  %v128_v57 = vpop.f32.mrf.mxu0 }
  0xdd   :  { %v328_v55 = vmul.f32 %v307_v46, %v161_v52  ;;  %v140_v59 = vpop.f32.mrf.mxu1  ;;  %395 = vst [vmem:[#allocation6 + $0x68] sm:$0xff] %v379_v48  ;;  %v317_v60 = vmul.f32 %v658_v53, %v128_v57 }
  0xde   :  { %v321_v61 = vmul.f32 %v660_v56, %v140_v59  ;;  %384 = vst [vmem:[#allocation6 + $0x10] sm:$0xff] %v368_v49  ;;  %v344_v62 = vmul.f32 %v665_v58, %v324_v54 }
  0xdf   :  { %v348_v63 = vmul.f32 %v665_v58, %v328_v55  ;;  %388 = vst [vmem:[#allocation6 + $0x30] sm:$0xff] %v372_v50  ;;  %v337_v0 = vmul.f32 %v665_v58, %v317_v60 }
  0xe0   :  { %v341_v1 = vmul.f32 %v665_v58, %v321_v61  ;;  %v360_v3 = vadd.f32 1.0, %v344_v62 }
  0xe1   :  { %v364_v2 = vadd.f32 1.0, %v348_v63  ;;  %v353_v4 = vadd.f32 1.0, %v337_v0 }
  0xe2   :  { %v357_v5 = vadd.f32 1.0, %v341_v1  ;;  %v376_v7 = vmul.f32 0.5, %v360_v3 }
  0xe3   :  { %v380_v8 = vmul.f32 0.5, %v364_v2  ;;  %v369_v53 = vmul.f32 0.5, %v353_v4  ;;  %v152_v56 = vpop.f32.mrf.mxu2 }
  0xe4   :  { %v373_v9 = vmul.f32 0.5, %v357_v5  ;;  %v164_v10 = vpop.f32.mrf.mxu3  ;;  %392 = vst [vmem:[#allocation6 + $0x50] sm:$0xff] %v376_v7  ;;  %v325_v11 = vmul.f32 %v673_v20, %v152_v56 }
  0xe5   :  { %v329_v12 = vmul.f32 %v312_v6, %v164_v10  ;;  %396 = vst [vmem:[#allocation6 + $0x70] sm:$0xff] %v380_v8 }
  0xe6   :  { %385 = vst [vmem:[#allocation6 + $0x18] sm:$0xff] %v369_v53  ;;  %v345_v13 = vmul.f32 %v665_v58, %v325_v11 }
  0xe7   :  { %v349_v14 = vmul.f32 %v665_v58, %v329_v12  ;;  %389 = vst [vmem:[#allocation6 + $0x38] sm:$0xff] %v373_v9 }
  0xe8   :  { %v361_v15 = vadd.f32 1.0, %v345_v13 }
  0xe9   :  { %v365_v16 = vadd.f32 1.0, %v349_v14 }
  0xea   :  { %v377_v17 = vmul.f32 0.5, %v361_v15 }
  0xeb   :  { %v381_v18 = vmul.f32 0.5, %v365_v16 }
  0xec   :  { %393 = vst [vmem:[#allocation6 + $0x58] sm:$0xff] %v377_v17 }
  0xed   :  { %397 = vst [vmem:[#allocation6 + $0x78] sm:$0xff] %v381_v18 }
  0xee   :  { %410 = dma.vmem_to_hbm [thread:$0]  %s403_s3, 2048, %s405_s12, [#allocation5], %s527_s20, %s527_s20, %s528_s21  }
  0xef   :  { %524 = dma.done.wait [#allocation5], 2048  }
  0xf0   :  { %525 = vsyncadd [#allocation5], 4294965248 }
  0xf1   :  { %415 = vsyncpa [#allocation4], 1 }
  0xf2   :  { %416 = vsyncpa [#allocation5], 1 }

</bundles_post_ra>
